<compile_context>
chip_gen: v5e
topology: v5e:2x2
jax: 0.10.0
libtpu: 0.0.40
codegen_flags: <defaults>
</compile_context>

<pallas_src>
import jax
import jax.numpy as jnp
from jax.experimental import pallas as pl
from jax.experimental.pallas import tpu as pltpu

C_IN = 576       # conv2d61 in_channels  / conv2d62 out_channels
C_MID = 144      # conv2d61 out_channels / conv2d62 in_channels
C_MID_PAD = 256  # zero-padded hidden width: lane-dense h, MXU-aligned K


def _cdiv(a, b):
    return (a + b - 1) // b


def _round_up(x, m):
    return _cdiv(x, m) * m


def se_bottleneck_kernel(x_ref, w1_ref, b1_ref, w2_ref, b2_ref, o_ref):
    # x_ref : (tm, 576)   f32   rows = flattened N*H*W
    # w1_ref: (576, 256)  bf16  pre-transposed, zero-padded, pre-cast
    # b1_ref: (1, 256)    f32   zero-padded
    # w2_ref: (256, 576)  bf16  pre-transposed, zero-padded, pre-cast
    # b2_ref: (1, 576)    f32
    # o_ref : (tm, 576)   f32
    x_bf = x_ref[...].astype(jnp.bfloat16)
    h = jnp.dot(x_bf, w1_ref[...], preferred_element_type=jnp.float32)
    h = jnp.maximum(h + b1_ref[...], 0.0)                 # bias + ReLU in f32 (VPU)
    y = jnp.dot(h.astype(jnp.bfloat16), w2_ref[...],
                preferred_element_type=jnp.float32)
    o_ref[...] = (y + b2_ref[...]).astype(o_ref.dtype)


def prepare_params(w1, b1, w2, b2):
    """One-time parameter prep (hoisted out of the per-call hot path):
    (Cout, Cin, 1, 1) conv weights -> (Cin, Cout) bf16 matmul weights, with the
    144-wide hidden dim zero-padded to 256.  Exact: padded b1 entries are zero,
    padded w2 rows are zero, so ReLU(x@0 + 0) @ 0 contributes nothing."""
    w1_mat = jnp.transpose(w1.reshape(C_MID, C_IN), (1, 0))            # (576,144)
    w1_mat = jnp.pad(w1_mat, ((0, 0), (0, C_MID_PAD - C_MID))).astype(jnp.bfloat16)
    b1_row = jnp.pad(b1.reshape(1, C_MID),
                     ((0, 0), (0, C_MID_PAD - C_MID))).astype(jnp.float32)
    w2_mat = jnp.transpose(w2.reshape(C_IN, C_MID), (1, 0))            # (144,576)
    w2_mat = jnp.pad(w2_mat, ((0, C_MID_PAD - C_MID), (0, 0))).astype(jnp.bfloat16)
    b2_row = b2.reshape(1, C_IN).astype(jnp.float32)
    return w1_mat, b1_row, w2_mat, b2_row


@jax.jit
def se_bottleneck(x_nchw, w1_mat, b1_row, w2_mat, b2_row):
    """x_nchw: (N, 576, H, W) f32; params already prepared by prepare_params.
    Returns (N, 576, H, W) f32 = conv1x1 -> ReLU -> conv1x1."""
    N, C, H, W = x_nchw.shape
    assert C == C_IN

    # Glue: flatten spatial, channels last -> rows of features (free at M=1).
    x_rows = jnp.transpose(x_nchw, (0, 2, 3, 1)).reshape(N * H * W, C)
    M = x_rows.shape[0]

    if M <= 8:
        # Single full-array block (spec case M=1): no pad / slice glue needed.
        tm, m_pad, grid = M, M, (1,)
    else:
        # >= 2 balanced blocks: engages both v7x TensorCores, caps tm at 512
        # rows so VMEM stays small everywhere, and never ~doubles work via
        # tail padding (padding is < tm rows and tm ~ M / nblocks).
        nblocks = max(2, _cdiv(M, 512))
        tm = _round_up(_cdiv(M, nblocks), 8)
        m_pad = _round_up(M, tm)
        grid = (m_pad // tm,)

    if m_pad != M:
        x_rows = jnp.pad(x_rows, ((0, m_pad - M), (0, 0)))

    cost = pl.CostEstimate(
        flops=2 * 2 * m_pad * C_IN * C_MID_PAD,               # two matmuls
        transcendentals=0,
        bytes_accessed=((w1_mat.size + w2_mat.size) * 2       # bf16 weights
                        + (b1_row.size + b2_row.size) * 4     # f32 biases
                        + 2 * m_pad * C_IN * 4),              # x + out (f32)
    )

    out_rows = pl.pallas_call(
        se_bottleneck_kernel,
        out_shape=jax.ShapeDtypeStruct((m_pad, C_IN), jnp.float32),
        grid=grid,
        in_specs=[
            pl.BlockSpec((tm, C_IN), lambda i: (i, 0)),           # activations: tiled
            pl.BlockSpec((C_IN, C_MID_PAD), lambda i: (0, 0)),    # weights: resident
            pl.BlockSpec((1, C_MID_PAD), lambda i: (0, 0)),
            pl.BlockSpec((C_MID_PAD, C_IN), lambda i: (0, 0)),
            pl.BlockSpec((1, C_IN), lambda i: (0, 0)),
        ],
        out_specs=pl.BlockSpec((tm, C_IN), lambda i: (i, 0)),
        compiler_params=pltpu.CompilerParams(
            dimension_semantics=("parallel",),
        ),
        cost_estimate=cost,
    )(x_rows, w1_mat, b1_row, w2_mat, b2_row)

    if m_pad != M:
        out_rows = out_rows[:M]
    # Glue: back to NCHW (free at M=1).
    return jnp.transpose(out_rows.reshape(N, H, W, C_IN), (0, 3, 1, 2))


if __name__ == "__main__":
    key = jax.random.PRNGKey(0)
    kx, kw1, kb1, kw2, kb2 = jax.random.split(key, 5)

    # Input shape implied by the module: (1, 576, 1, 1)
    x = jax.random.normal(kx, (1, C_IN, 1, 1), dtype=jnp.float32)

    # Deterministic parameter init (uniform, PyTorch-conv-like fan-in scaling).
    bound1 = 1.0 / (C_IN ** 0.5)
    bound2 = 1.0 / (C_MID ** 0.5)
    w1 = jax.random.uniform(kw1, (C_MID, C_IN, 1, 1), jnp.float32, -bound1, bound1)
    b1 = jax.random.uniform(kb1, (C_MID,), jnp.float32, -bound1, bound1)
    w2 = jax.random.uniform(kw2, (C_IN, C_MID, 1, 1), jnp.float32, -bound2, bound2)
    b2 = jax.random.uniform(kb2, (C_IN,), jnp.float32, -bound2, bound2)

    # One-time parameter prep (hoisted out of the call path).
    w1_mat, b1_row, w2_mat, b2_row = jax.block_until_ready(
        prepare_params(w1, b1, w2, b2))

    out = jax.block_until_ready(se_bottleneck(x, w1_mat, b1_row, w2_mat, b2_row))
    assert out.shape == (1, C_IN, 1, 1)

    # Tight check: reference using the same bf16 (padded) weights + f32 accum.
    xr = x.reshape(1, C_IN)
    h_bf = jnp.dot(xr.astype(jnp.bfloat16), w1_mat,
                   preferred_element_type=jnp.float32) + b1_row
    h_bf = jnp.maximum(h_bf, 0.0)
    y_bf = jnp.dot(h_bf.astype(jnp.bfloat16), w2_mat,
                   preferred_element_type=jnp.float32) + b2_row
    assert jnp.allclose(out.reshape(1, C_IN), y_bf, atol=1e-3, rtol=1e-3)

    # Loose check against full-f32 module semantics (bf16 weight quant noise).
    h_f32 = jnp.maximum(xr @ w1.reshape(C_MID, C_IN).T + b1, 0.0)
    y_f32 = h_f32 @ w2.reshape(C_IN, C_MID).T + b2
    assert jnp.allclose(out.reshape(1, C_IN), y_f32, atol=1e-1, rtol=1e-1)

    print("KERNEL_OK")
</pallas_src>

<mosaic_0001>
module attributes {stable_mosaic.version = 11 : i64} {
  func.func @se_bottleneck_kernel(%arg0: i32, %arg1: memref<1x576xf32, #tpu.memory_space<vmem>>, %arg2: memref<576x256xbf16, #tpu.memory_space<vmem>>, %arg3: memref<1x256xf32, #tpu.memory_space<vmem>>, %arg4: memref<256x576xbf16, #tpu.memory_space<vmem>>, %arg5: memref<1x576xf32, #tpu.memory_space<vmem>>, %arg6: memref<1x576xf32, #tpu.memory_space<vmem>>) attributes {dimension_semantics = [#tpu.dimension_semantics<parallel>], iteration_bounds = array<i64: 1>, scalar_prefetch = 0 : i64, scratch_operands = 0 : i64, tpu.core_type = #tpu.core_type<tc>, window_params = [{transform_indices = @transform_0, window_bounds = array<i64: 1, 576>}, {pipeline_mode = #tpu.pipeline_mode<synchronous>, transform_indices = @transform_1, window_bounds = array<i64: 576, 256>}, {pipeline_mode = #tpu.pipeline_mode<synchronous>, transform_indices = @transform_2, window_bounds = array<i64: 1, 256>}, {pipeline_mode = #tpu.pipeline_mode<synchronous>, transform_indices = @transform_3, window_bounds = array<i64: 256, 576>}, {pipeline_mode = #tpu.pipeline_mode<synchronous>, transform_indices = @transform_4, window_bounds = array<i64: 1, 576>}, {transform_indices = @transform_5, window_bounds = array<i64: 1, 576>}]} {
    %c0 = arith.constant 0 : index
    %c0_0 = arith.constant 0 : index
    %0 = vector.load %arg1[%c0, %c0_0] : memref<1x576xf32, #tpu.memory_space<vmem>>, vector<1x576xf32>
    %1 = arith.truncf %0 : vector<1x576xf32> to vector<1x576xbf16>
    %c0_1 = arith.constant 0 : index
    %c0_2 = arith.constant 0 : index
    %2 = vector.load %arg2[%c0_1, %c0_2] : memref<576x256xbf16, #tpu.memory_space<vmem>>, vector<576x256xbf16>
    %cst = arith.constant dense<0.000000e+00> : vector<1x256xf32>
    %3 = tpu.matmul %1, %2, %cst {dimension_numbers = #tpu.dot_dimension_numbers<[1], [0], [0], [1], [0, 0, 1, 1], [], []>} : vector<1x576xbf16>, vector<576x256xbf16>, vector<1x256xf32> -> vector<1x256xf32>
    %c0_3 = arith.constant 0 : index
    %c0_4 = arith.constant 0 : index
    %4 = vector.load %arg3[%c0_3, %c0_4] : memref<1x256xf32, #tpu.memory_space<vmem>>, vector<1x256xf32>
    %5 = arith.addf %3, %4 : vector<1x256xf32>
    %cst_5 = arith.constant 0.000000e+00 : f32
    %6 = vector.broadcast %cst_5 : f32 to vector<1x256xf32>
    %7 = arith.maximumf %5, %6 : vector<1x256xf32>
    %8 = arith.truncf %7 : vector<1x256xf32> to vector<1x256xbf16>
    %c0_6 = arith.constant 0 : index
    %c0_7 = arith.constant 0 : index
    %9 = vector.load %arg4[%c0_6, %c0_7] : memref<256x576xbf16, #tpu.memory_space<vmem>>, vector<256x576xbf16>
    %cst_8 = arith.constant dense<0.000000e+00> : vector<1x576xf32>
    %10 = tpu.matmul %8, %9, %cst_8 {dimension_numbers = #tpu.dot_dimension_numbers<[1], [0], [0], [1], [0, 0, 1, 1], [], []>} : vector<1x256xbf16>, vector<256x576xbf16>, vector<1x576xf32> -> vector<1x576xf32>
    %c0_9 = arith.constant 0 : index
    %c0_10 = arith.constant 0 : index
    %11 = vector.load %arg5[%c0_9, %c0_10] : memref<1x576xf32, #tpu.memory_space<vmem>>, vector<1x576xf32>
    %12 = arith.addf %10, %11 : vector<1x576xf32>
    %c0_11 = arith.constant 0 : index
    %c0_12 = arith.constant 0 : index
    %13 = vector.load %arg6[%c0_11, %c0_12] : memref<1x576xf32, #tpu.memory_space<vmem>>, vector<1x576xf32>
    tpu.vector_store %arg6[%c0_11, %c0_12], %12 {strides = array<i32>} : memref<1x576xf32, #tpu.memory_space<vmem>>, vector<1x576xf32>,
    return
  }
  func.func @transform_0(%arg0: i32) -> (i32, i32) {
    %c0_i32 = arith.constant 0 : i32
    %c0_i32_0 = arith.constant 0 : i32
    return %arg0, %c0_i32 : i32, i32
  }
  func.func @transform_1(%arg0: i32) -> (i32, i32) {
    %c0_i32 = arith.constant 0 : i32
    %c0_i32_0 = arith.constant 0 : i32
    %c0_i32_1 = arith.constant 0 : i32
    return %c0_i32, %c0_i32_0 : i32, i32
  }
  func.func @transform_2(%arg0: i32) -> (i32, i32) {
    %c0_i32 = arith.constant 0 : i32
    %c0_i32_0 = arith.constant 0 : i32
    %c0_i32_1 = arith.constant 0 : i32
    return %c0_i32, %c0_i32_0 : i32, i32
  }
  func.func @transform_3(%arg0: i32) -> (i32, i32) {
    %c0_i32 = arith.constant 0 : i32
    %c0_i32_0 = arith.constant 0 : i32
    %c0_i32_1 = arith.constant 0 : i32
    return %c0_i32, %c0_i32_0 : i32, i32
  }
  func.func @transform_4(%arg0: i32) -> (i32, i32) {
    %c0_i32 = arith.constant 0 : i32
    %c0_i32_0 = arith.constant 0 : i32
    %c0_i32_1 = arith.constant 0 : i32
    return %c0_i32, %c0_i32_0 : i32, i32
  }
  func.func @transform_5(%arg0: i32) -> (i32, i32) {
    %c0_i32 = arith.constant 0 : i32
    %c0_i32_0 = arith.constant 0 : i32
    return %arg0, %c0_i32 : i32, i32
  }
}

</mosaic_0001>

<bundles_post_ra>
// kernel: se_bottleneck.1
= control target key start
LH: loop header
LB: loop body
LE: loop exit
PB: predicated region body
PF: predicated region fallthrough
CT: control target
= control target key end

     0   :  { %vm477_vm0 = vcmask 523264   ;;  %s3092_s0 = inlined_call_operand.vmem [shape: f32[1,576], index: 0, kind: input, shape index: {}]   ;;  %s3093_s1 = inlined_call_operand.vmem [shape: bf16[576,256], index: 1, kind: input, shape index: {}]   ;;  %s3094_s2 = inlined_call_operand.vmem [shape: f32[1,256], index: 2, kind: input, shape index: {}]   ;;  %s3095_s3 = inlined_call_operand.vmem [shape: bf16[256,576], index: 3, kind: input, shape index: {}]   ;;  %s3096_s4 = inlined_call_operand.vmem [shape: f32[1,576], index: 4, kind: input, shape index: {}]   ;;  %s3097_s5 = inlined_call_operand.hbm [shape: f32[1,576], index: 5, kind: output, shape index: {}]  }
   0x1   :  { %v1366_v0 = vld [vmem:[%s3093_s1 + $0x70] sm:$0xf]  ;;  %v1933_v1 = vld [vmem:[%s3093_s1 + $0x74] sm:$0xf0]  ;;  %v1358_v11 = vld [vmem:[%s3093_s1 + $0x60] sm:$0xf] }
   0x2   :  { %v1430_v2 = vld [vmem:[%s3093_s1 + $0xf0] sm:$0xf]  ;;  %v1367_v3 = vor.u32 %v1933_v1, %v1366_v0  ;;  %v1949_v4 = vld [vmem:[%s3093_s1 + $0xf4] sm:$0xf0]  ;;  %v1931_v13 = vld [vmem:[%s3093_s1 + $0x64] sm:$0xf0] }
   0x3   :  { %v1494_v5 = vld [vmem:[%s3093_s1 + $0x170] sm:$0xf]  ;;  %v1965_v6 = vld [vmem:[%s3093_s1 + $0x174] sm:$0xf0]  ;;  %v1431_v7 = vor.u32 %v1949_v4, %v1430_v2  ;;  %v1422_v14 = vld [vmem:[%s3093_s1 + $0xe0] sm:$0xf]  ;;  %v1359_v16 = vor.u32 %v1931_v13, %v1358_v11 }
   0x4   :  { %v1495_v8 = vor.u32 %v1965_v6, %v1494_v5  ;;  %v1558_v9 = vld [vmem:[%s3093_s1 + $0x1f0] sm:$0xf]  ;;  %v1981_v10 = vld [vmem:[%s3093_s1 + $0x1f4] sm:$0xf0]  ;;  %481 = vmatpush.bf16.msra.mxu0 %v1367_v3  ;;  %v1947_v15 = vld [vmem:[%s3093_s1 + $0xe4] sm:$0xf0] }
   0x5   :  { %v1559_v12 = vor.u32 %v1981_v10, %v1558_v9  ;;  %494 = vmatpush.bf16.msra.mxu1 %v1431_v7  ;;  %v1423_v17 = vor.u32 %v1947_v15, %v1422_v14  ;;  %v1486_v18 = vld [vmem:[%s3093_s1 + $0x160] sm:$0xf]  ;;  %v1963_v19 = vld [vmem:[%s3093_s1 + $0x164] sm:$0xf0]  ;;  %v1350_v23 = vld [vmem:[%s3093_s1 + $0x50] sm:$0xf] }
   0x6   :  { %507 = vmatpush.bf16.msra.mxu2 %v1495_v8  ;;  %v1550_v20 = vld [vmem:[%s3093_s1 + $0x1e0] sm:$0xf]  ;;  %v1487_v21 = vor.u32 %v1963_v19, %v1486_v18  ;;  %v1979_v22 = vld [vmem:[%s3093_s1 + $0x1e4] sm:$0xf0]  ;;  %v1929_v24 = vld [vmem:[%s3093_s1 + $0x54] sm:$0xf0] }
   0x7   :  { %520 = vmatpush.bf16.msra.mxu3 %v1559_v12  ;;  %v1551_v25 = vor.u32 %v1979_v22, %v1550_v20  ;;  %v1414_v26 = vld [vmem:[%s3093_s1 + $0xd0] sm:$0xf]  ;;  %v1945_v27 = vld [vmem:[%s3093_s1 + $0xd4] sm:$0xf0]  ;;  %v1351_v29 = vor.u32 %v1929_v24, %v1350_v23  ;;  %v1342_v35 = vld [vmem:[%s3093_s1 + $0x40] sm:$0xf] }
   0x8   :  { %v1478_v28 = vld [vmem:[%s3093_s1 + $0x150] sm:$0xf]  ;;  %482 = vmatpush.bf16.msra.mxu0 %v1359_v16  ;;  %v1961_v30 = vld [vmem:[%s3093_s1 + $0x154] sm:$0xf0]  ;;  %v1415_v33 = vor.u32 %v1945_v27, %v1414_v26  ;;  %v1927_v36 = vld [vmem:[%s3093_s1 + $0x44] sm:$0xf0] }
   0x9   :  { %v1542_v31 = vld [vmem:[%s3093_s1 + $0x1d0] sm:$0xf]  ;;  %v1977_v32 = vld [vmem:[%s3093_s1 + $0x1d4] sm:$0xf0]  ;;  %495 = vmatpush.bf16.msra.mxu1 %v1423_v17  ;;  %v1479_v34 = vor.u32 %v1961_v30, %v1478_v28  ;;  %v1406_v37 = vld [vmem:[%s3093_s1 + $0xc0] sm:$0xf]  ;;  %v1343_v44 = vor.u32 %v1927_v36, %v1342_v35 }
   0xa   :  { %508 = vmatpush.bf16.msra.mxu2 %v1487_v21  ;;  %v1543_v38 = vor.u32 %v1977_v32, %v1542_v31  ;;  %v1943_v39 = vld [vmem:[%s3093_s1 + $0xc4] sm:$0xf0]  ;;  %v1470_v40 = vld [vmem:[%s3093_s1 + $0x140] sm:$0xf]  ;;  %v1334_v47 = vld [vmem:[%s3093_s1 + $0x30] sm:$0xf] }
   0xb   :  { %521 = vmatpush.bf16.msra.mxu3 %v1551_v25  ;;  %v1959_v41 = vld [vmem:[%s3093_s1 + $0x144] sm:$0xf0]  ;;  %v1534_v42 = vld [vmem:[%s3093_s1 + $0x1c0] sm:$0xf]  ;;  %v1407_v45 = vor.u32 %v1943_v39, %v1406_v37  ;;  %v1925_v48 = vld [vmem:[%s3093_s1 + $0x34] sm:$0xf0] }
   0xc   :  { %v1975_v43 = vld [vmem:[%s3093_s1 + $0x1c4] sm:$0xf0]  ;;  %483 = vmatpush.bf16.msra.mxu0 %v1351_v29  ;;  %v1471_v46 = vor.u32 %v1959_v41, %v1470_v40  ;;  %v1398_v49 = vld [vmem:[%s3093_s1 + $0xb0] sm:$0xf]  ;;  %v1941_v51 = vld [vmem:[%s3093_s1 + $0xb4] sm:$0xf0]  ;;  %v1335_v56 = vor.u32 %v1925_v48, %v1334_v47 }
   0xd   :  { %496 = vmatpush.bf16.msra.mxu1 %v1415_v33  ;;  %v1535_v50 = vor.u32 %v1975_v43, %v1534_v42  ;;  %v1462_v52 = vld [vmem:[%s3093_s1 + $0x130] sm:$0xf]  ;;  %v1957_v53 = vld [vmem:[%s3093_s1 + $0x134] sm:$0xf0]  ;;  %v1399_v57 = vor.u32 %v1941_v51, %v1398_v49  ;;  %v1326_v59 = vld [vmem:[%s3093_s1 + $0x20] sm:$0xf] }
   0xe   :  { %509 = vmatpush.bf16.msra.mxu2 %v1479_v34  ;;  %v1526_v54 = vld [vmem:[%s3093_s1 + $0x1b0] sm:$0xf]  ;;  %v1973_v55 = vld [vmem:[%s3093_s1 + $0x1b4] sm:$0xf0]  ;;  %v1463_v58 = vor.u32 %v1957_v53, %v1462_v52  ;;  %v1923_v60 = vld [vmem:[%s3093_s1 + $0x24] sm:$0xf0] }
   0xf   :  { %522 = vmatpush.bf16.msra.mxu3 %v1543_v38  ;;  %v1390_v61 = vld [vmem:[%s3093_s1 + $0xa0] sm:$0xf]  ;;  %v1527_v62 = vor.u32 %v1973_v55, %v1526_v54  ;;  %v1939_v63 = vld [vmem:[%s3093_s1 + $0xa4] sm:$0xf0]  ;;  %v1327_v4 = vor.u32 %v1923_v60, %v1326_v59  ;;  %v1318_v7 = vld [vmem:[%s3093_s1 + $0x10] sm:$0xf] }
  0x10   :  { %484 = vmatpush.bf16.msra.mxu0 %v1343_v44  ;;  %v1454_v0 = vld [vmem:[%s3093_s1 + $0x120] sm:$0xf]  ;;  %v1955_v1 = vld [vmem:[%s3093_s1 + $0x124] sm:$0xf0]  ;;  %v1391_v5 = vor.u32 %v1939_v63, %v1390_v61  ;;  %v1921_v8 = vld [vmem:[%s3093_s1 + $0x14] sm:$0xf0] }
  0x11   :  { %497 = vmatpush.bf16.msra.mxu1 %v1407_v45  ;;  %v1518_v2 = vld [vmem:[%s3093_s1 + $0x1a0] sm:$0xf]  ;;  %v1971_v3 = vld [vmem:[%s3093_s1 + $0x1a4] sm:$0xf0]  ;;  %v1455_v6 = vor.u32 %v1955_v1, %v1454_v0  ;;  %v1382_v9 = vld [vmem:[%s3093_s1 + $0x90] sm:$0xf]  ;;  %v1319_v17 = vor.u32 %v1921_v8, %v1318_v7 }
  0x12   :  { %510 = vmatpush.bf16.msra.mxu2 %v1471_v46  ;;  %v1519_v10 = vor.u32 %v1971_v3, %v1518_v2  ;;  %v1937_v11 = vld [vmem:[%s3093_s1 + $0x94] sm:$0xf0]  ;;  %v1446_v12 = vld [vmem:[%s3093_s1 + $0x110] sm:$0xf]  ;;  %v1310_v16 = vld [vmem:[%s3093_s1] sm:$0xf] }
  0x13   :  { %523 = vmatpush.bf16.msra.mxu3 %v1535_v50  ;;  %v1953_v13 = vld [vmem:[%s3093_s1 + $0x114] sm:$0xf0]  ;;  %v1510_v14 = vld [vmem:[%s3093_s1 + $0x190] sm:$0xf]  ;;  %v1919_v18 = vld [vmem:[%s3093_s1 + $0x4] sm:$0xf0]  ;;  %v1383_v21 = vor.u32 %v1937_v11, %v1382_v9 }
  0x14   :  { %485 = vmatpush.bf16.msra.mxu0 %v1335_v56  ;;  %v1969_v15 = vld [vmem:[%s3093_s1 + $0x194] sm:$0xf0]  ;;  %v1374_v19 = vld [vmem:[%s3093_s1 + $0x80] sm:$0xf]  ;;  %v1935_v20 = vld [vmem:[%s3093_s1 + $0x84] sm:$0xf0]  ;;  %v1447_v22 = vor.u32 %v1953_v13, %v1446_v12  ;;  %v1311_v33 = vor.u32 %v1919_v18, %v1310_v16 }
  0x15   :  { %498 = vmatpush.bf16.msra.mxu1 %v1399_v57  ;;  %v1438_v23 = vld [vmem:[%s3093_s1 + $0x100] sm:$0xf]  ;;  %v1951_v24 = vld [vmem:[%s3093_s1 + $0x104] sm:$0xf0]  ;;  %v1511_v26 = vor.u32 %v1969_v15, %v1510_v14  ;;  %v1590_v29 = vld [vmem:[%s3093_s1 + $0x230] sm:$0xf]  ;;  %v1375_v37 = vor.u32 %v1935_v20, %v1374_v19 }
  0x16   :  { %511 = vmatpush.bf16.msra.mxu2 %v1463_v58  ;;  %v2317_v25 = vld [vmem:[%s3092_s0] sm:$0x1f]  ;;  %v1967_v28 = vld [vmem:[%s3093_s1 + $0x184] sm:$0xf0]  ;;  %v1989_v30 = vld [vmem:[%s3093_s1 + $0x234] sm:$0xf0]  ;;  %v1439_v38 = vor.u32 %v1951_v24, %v1438_v23 }
  0x17   :  { %524 = vmatpush.bf16.msra.mxu3 %v1527_v62  ;;  %v1502_v27 = vld [vmem:[%s3093_s1 + $0x180] sm:$0xf]  ;;  %v1932_v31 = vld [vmem:[%s3093_s1 + $0x74] sm:$0xf]  ;;  %v1368_v32 = vld [vmem:[%s3093_s1 + $0x78] sm:$0xf0]  ;;  %v1591_v44 = vor.u32 %v1989_v30, %v1590_v29 }
  0x18   :  { %486 = vmatpush.bf16.msra.mxu0 %v1327_v4  ;;  %v1948_v34 = vld [vmem:[%s3093_s1 + $0xf4] sm:$0xf]  ;;  %v1432_v35 = vld [vmem:[%s3093_s1 + $0xf8] sm:$0xf0]  ;;  %v24_v36 = vperm.slane %v2317_v25, 0  ;;  %v25_v41 = vperm.slane %v2317_v25, 1  ;;  %v1503_v43 = vor.u32 %v1967_v28, %v1502_v27  ;;  %v1371_v46 = vor.u32 %v1932_v31, %v1368_v32 }
  0x19   :  { %499 = vmatpush.bf16.msra.mxu1 %v1391_v5  ;;  %v1964_v39 = vld [vmem:[%s3093_s1 + $0x174] sm:$0xf]  ;;  %v1496_v40 = vld [vmem:[%s3093_s1 + $0x178] sm:$0xf0]  ;;  %v26_v42 = vperm.slane %v2317_v25, 2  ;;  %v1435_v47 = vor.u32 %v1948_v34, %v1432_v35  ;;  %v27_v50 = vperm.slane %v2317_v25, 3 }
  0x1a   :  { %512 = vmatpush.bf16.msra.mxu2 %v1455_v6  ;;  %v1582_v45 = vld [vmem:[%s3093_s1 + $0x220] sm:$0xf]  ;;  %v1987_v48 = vld [vmem:[%s3093_s1 + $0x224] sm:$0xf0]  ;;  %v1930_v49 = vld [vmem:[%s3093_s1 + $0x64] sm:$0xf]  ;;  %v1499_v51 = vor.u32 %v1964_v39, %v1496_v40  ;;  %v2362_v52 = vpack.c.bf16 %v24_v36, %v24_v36  ;;  %v2379_v58 = vpack.c.bf16 %v25_v41, %v25_v41 }
  0x1b   :  { %525 = vmatpush.bf16.msra.mxu3 %v1519_v10  ;;  %v1360_v53 = vld [vmem:[%s3093_s1 + $0x68] sm:$0xf0]  ;;  %v1946_v54 = vld [vmem:[%s3093_s1 + $0xe4] sm:$0xf]  ;;  %v2381_v59 = vpack.c.bf16 %v26_v42, %v26_v42  ;;  %v1583_v60 = vor.u32 %v1987_v48, %v1582_v45  ;;  %v2383_v61 = vpack.c.bf16 %v27_v50, %v27_v50  ;;  %v1574_v0 = vld [vmem:[%s3093_s1 + $0x210] sm:$0xf] }
  0x1c   :  { %487 = vmatpush.bf16.msra.mxu0 %v1319_v17  ;;  %v1424_v55 = vld [vmem:[%s3093_s1 + $0xe8] sm:$0xf0]  ;;  %v1962_v56 = vld [vmem:[%s3093_s1 + $0x164] sm:$0xf]  ;;  %v1363_v62 = vor.u32 %v1930_v49, %v1360_v53  ;;  %v1985_v1 = vld [vmem:[%s3093_s1 + $0x214] sm:$0xf0] }
  0x1d   :  { %500 = vmatpush.bf16.msra.mxu1 %v1383_v21  ;;  %v1488_v57 = vld [vmem:[%s3093_s1 + $0x168] sm:$0xf0]  ;;  %v1427_v63 = vor.u32 %v1946_v54, %v1424_v55  ;;  %v1928_v2 = vld [vmem:[%s3093_s1 + $0x54] sm:$0xf]  ;;  %v1352_v4 = vld [vmem:[%s3093_s1 + $0x58] sm:$0xf0]  ;;  %v1575_v9 = vor.u32 %v1985_v1, %v1574_v0 }
  0x1e   :  { %513 = vmatpush.bf16.msra.mxu2 %v1447_v22  ;;  %v1491_v3 = vor.u32 %v1962_v56, %v1488_v57  ;;  %v1944_v5 = vld [vmem:[%s3093_s1 + $0xd4] sm:$0xf]  ;;  %v1416_v6 = vld [vmem:[%s3093_s1 + $0xd8] sm:$0xf0]  ;;  %v1566_v10 = vld [vmem:[%s3093_s1 + $0x200] sm:$0xf]  ;;  %v1355_v11 = vor.u32 %v1928_v2, %v1352_v4 }
  0x1f   :  { %526 = vmatpush.bf16.msra.mxu3 %v1511_v26  ;;  %v1960_v7 = vld [vmem:[%s3093_s1 + $0x154] sm:$0xf]  ;;  %v1480_v8 = vld [vmem:[%s3093_s1 + $0x158] sm:$0xf0]  ;;  %v1419_v12 = vor.u32 %v1944_v5, %v1416_v6  ;;  %v1983_v13 = vld [vmem:[%s3093_s1 + $0x204] sm:$0xf0] }
  0x20   :  { %488 = vmatpush.bf16.msra.mxu0 %v1311_v33  ;;  %v1926_v14 = vld [vmem:[%s3093_s1 + $0x44] sm:$0xf]  ;;  %v1344_v15 = vld [vmem:[%s3093_s1 + $0x48] sm:$0xf0]  ;;  %v1483_v16 = vor.u32 %v1960_v7, %v1480_v8  ;;  %v1980_v21 = vld [vmem:[%s3093_s1 + $0x1f4] sm:$0xf]  ;;  %v1567_v23 = vor.u32 %v1983_v13, %v1566_v10 }
  0x21   :  { %501 = vmatpush.bf16.msra.mxu1 %v1375_v37  ;;  %v1942_v17 = vld [vmem:[%s3093_s1 + $0xc4] sm:$0xf]  ;;  %v1408_v18 = vld [vmem:[%s3093_s1 + $0xc8] sm:$0xf0]  ;;  %v1560_v22 = vld [vmem:[%s3093_s1 + $0x1f8] sm:$0xf0]  ;;  %v1347_v24 = vor.u32 %v1926_v14, %v1344_v15 }
  0x22   :  { %514 = vmatpush.bf16.msra.mxu2 %v1439_v38  ;;  %v1958_v19 = vld [vmem:[%s3093_s1 + $0x144] sm:$0xf]  ;;  %v1472_v20 = vld [vmem:[%s3093_s1 + $0x148] sm:$0xf0]  ;;  %v1411_v26 = vor.u32 %v1942_v17, %v1408_v18  ;;  %v1924_v27 = vld [vmem:[%s3093_s1 + $0x34] sm:$0xf]  ;;  %v1563_v31 = vor.u32 %v1980_v21, %v1560_v22 }
  0x23   :  { %527 = vmatpush.bf16.msra.mxu3 %v1503_v43  ;;  %489 = vmatmul.bf16.vlgmr.msra.gmra.mxu0 %v2362_v52  ;;  %v1336_v28 = vld [vmem:[%s3093_s1 + $0x38] sm:$0xf0]  ;;  %v28_v29 = vperm.slane %v2317_v25, 4  ;;  %v1475_v30 = vor.u32 %v1958_v19, %v1472_v20  ;;  %v1940_v32 = vld [vmem:[%s3093_s1 + $0xb4] sm:$0xf] }
  0x24   :  { %537 = vmatpush.bf16.msrb.mxu0 %v1591_v44  ;;  %502 = vmatmul.bf16.vlgmr.msra.gmra.mxu1 %v2379_v58  ;;  %v1400_v33 = vld [vmem:[%s3093_s1 + $0xb8] sm:$0xf0]  ;;  %v1956_v34 = vld [vmem:[%s3093_s1 + $0x134] sm:$0xf]  ;;  %v1978_v25 = vld [vmem:[%s3093_s1 + $0x1e4] sm:$0xf]  ;;  %v1339_v37 = vor.u32 %v1924_v27, %v1336_v28 }
  0x25   :  { %546 = vmatpush.bf16.msrb.mxu1 %v1371_v46  ;;  %515 = vmatmul.bf16.vlgmr.msra.gmra.mxu2 %v2381_v59  ;;  %v1464_v35 = vld [vmem:[%s3093_s1 + $0x138] sm:$0xf0]  ;;  %v1552_v36 = vld [vmem:[%s3093_s1 + $0x1e8] sm:$0xf0]  ;;  %v1403_v38 = vor.u32 %v1940_v32, %v1400_v33  ;;  %v1922_v39 = vld [vmem:[%s3093_s1 + $0x24] sm:$0xf]  ;;  %v2483_v46 = vpack.c.bf16 %v28_v29, %v28_v29 }
  0x26   :  { %559 = vmatpush.bf16.msrb.mxu2 %v1435_v47  ;;  %528 = vmatmul.bf16.vlgmr.msra.gmra.mxu3 %v2383_v61  ;;  %v1328_v40 = vld [vmem:[%s3093_s1 + $0x28] sm:$0xf0]  ;;  %v1467_v41 = vor.u32 %v1956_v34, %v1464_v35  ;;  %v1555_v42 = vor.u32 %v1978_v25, %v1552_v36  ;;  %v1938_v43 = vld [vmem:[%s3093_s1 + $0xa4] sm:$0xf]  ;;  %v1976_v48 = vld [vmem:[%s3093_s1 + $0x1d4] sm:$0xf] }
  0x27   :  { %572 = vmatpush.bf16.msrb.mxu3 %v1499_v51  ;;  %v1392_v44 = vld [vmem:[%s3093_s1 + $0xa8] sm:$0xf0]  ;;  %v1954_v45 = vld [vmem:[%s3093_s1 + $0x124] sm:$0xf]  ;;  %v1544_v49 = vld [vmem:[%s3093_s1 + $0x1d8] sm:$0xf0]  ;;  %v1331_v50 = vor.u32 %v1922_v39, %v1328_v40 }
  0x28   :  { %538 = vmatpush.bf16.msrb.mxu0 %v1583_v60  ;;  %v1456_v47 = vld [vmem:[%s3093_s1 + $0x128] sm:$0xf0]  ;;  %v1395_v51 = vor.u32 %v1938_v43, %v1392_v44  ;;  %v1920_v53 = vld [vmem:[%s3093_s1 + $0x14] sm:$0xf]  ;;  %v1320_v54 = vld [vmem:[%s3093_s1 + $0x18] sm:$0xf0]  ;;  %v1547_v56 = vor.u32 %v1976_v48, %v1544_v49 }
  0x29   :  { %547 = vmatpush.bf16.msrb.mxu1 %v1363_v62  ;;  %v1459_v55 = vor.u32 %v1954_v45, %v1456_v47  ;;  %v1936_v57 = vld [vmem:[%s3093_s1 + $0x94] sm:$0xf]  ;;  %v1384_v60 = vld [vmem:[%s3093_s1 + $0x98] sm:$0xf0]  ;;  %v1974_v0 = vld [vmem:[%s3093_s1 + $0x1c4] sm:$0xf] }
  0x2a   :  { %560 = vmatpush.bf16.msrb.mxu2 %v1427_v63  ;;  %v1952_v62 = vld [vmem:[%s3093_s1 + $0x114] sm:$0xf]  ;;  %v1448_v63 = vld [vmem:[%s3093_s1 + $0x118] sm:$0xf0]  ;;  %v1536_v1 = vld [vmem:[%s3093_s1 + $0x1c8] sm:$0xf0]  ;;  %v1387_v4 = vor.u32 %v1936_v57, %v1384_v60 }
  0x2b   :  { %573 = vmatpush.bf16.msrb.mxu3 %v1491_v3  ;;  %v1918_v2 = vld [vmem:[%s3093_s1 + $0x4] sm:$0xf]  ;;  %v1323_v3 = vor.u32 %v1920_v53, %v1320_v54  ;;  %v1312_v5 = vld [vmem:[%s3093_s1 + $0x8] sm:$0xf0]  ;;  %v1451_v8 = vor.u32 %v1952_v62, %v1448_v63  ;;  %v1528_v13 = vld [vmem:[%s3093_s1 + $0x1b8] sm:$0xf0] }
  0x2c   :  { %539 = vmatpush.bf16.msrb.mxu0 %v1575_v9  ;;  %v1934_v6 = vld [vmem:[%s3093_s1 + $0x84] sm:$0xf]  ;;  %v1376_v7 = vld [vmem:[%s3093_s1 + $0x88] sm:$0xf0]  ;;  %v1539_v9 = vor.u32 %v1974_v0, %v1536_v1  ;;  %v1988_v14 = vld [vmem:[%s3093_s1 + $0x234] sm:$0xf] }
  0x2d   :  { %548 = vmatpush.bf16.msrb.mxu1 %v1355_v11  ;;  %v1950_v10 = vld [vmem:[%s3093_s1 + $0x104] sm:$0xf]  ;;  %v1440_v11 = vld [vmem:[%s3093_s1 + $0x108] sm:$0xf0]  ;;  %v1592_v15 = vld [vmem:[%s3093_s1 + $0x238] sm:$0xf0] }
  0x2e   :  { %561 = vmatpush.bf16.msrb.mxu2 %v1419_v12  ;;  %v1972_v12 = vld [vmem:[%s3093_s1 + $0x1b4] sm:$0xf]  ;;  %v2027_v17 = vld [vmem:[%s3095_s3 + $0x128] sm:$0xf0] }
  0x2f   :  { %574 = vmatpush.bf16.msrb.mxu3 %v1483_v16  ;;  %v1740_v16 = vld [vmem:[%s3095_s3 + $0x118] sm:$0xf] }
  0x30   :  { %540 = vmatpush.bf16.msrb.mxu0 %v1567_v23 }
  0x31   :  { %549 = vmatpush.bf16.msrb.mxu1 %v1347_v24 }
  0x32   :  { %562 = vmatpush.bf16.msrb.mxu2 %v1411_v26 }
  0x33   :  { %575 = vmatpush.bf16.msrb.mxu3 %v1475_v30  ;;  %1596 = vmatmul.msk.bf16.vlgmr.msrb.gmra.mxu0 %vm477_vm0, %v2483_v46 }
  0x34   :  { %585 = vmatpush.bf16.msra.mxu0 %v1563_v31 }
  0x35   :  { %550 = vmatpush.bf16.msrb.mxu1 %v1339_v37 }
  0x36   :  { %563 = vmatpush.bf16.msrb.mxu2 %v1403_v38 }
  0x37   :  { %576 = vmatpush.bf16.msrb.mxu3 %v1467_v41 }
  0x38   :  { %586 = vmatpush.bf16.msra.mxu0 %v1555_v42 }
  0x39   :  { %551 = vmatpush.bf16.msrb.mxu1 %v1331_v50 }
  0x3a   :  { %564 = vmatpush.bf16.msrb.mxu2 %v1395_v51 }
  0x3b   :  { %577 = vmatpush.bf16.msrb.mxu3 %v1459_v55 }
  0x3c   :  { %587 = vmatpush.bf16.msra.mxu0 %v1547_v56 }
  0x3d   :  { %10 = vsyncpa [#allocation3], 0  ;;  %552 = vmatpush.bf16.msrb.mxu1 %v1323_v3  ;;  %v1315_v18 = vor.u32 %v1918_v2, %v1312_v5  ;;  %v1379_v19 = vor.u32 %v1934_v6, %v1376_v7  ;;  %v1443_v20 = vor.u32 %v1950_v10, %v1440_v11  ;;  %v1531_v21 = vor.u32 %v1972_v12, %v1528_v13  ;;  %v1970_v22 = vld [vmem:[%s3093_s1 + $0x1a4] sm:$0xf]  ;;  %v1520_v23 = vld [vmem:[%s3093_s1 + $0x1a8] sm:$0xf0] }
  0x3e   :  { %565 = vmatpush.bf16.msrb.mxu2 %v1387_v4  ;;  %v1595_v24 = vor.u32 %v1988_v14, %v1592_v15  ;;  %v1986_v26 = vld [vmem:[%s3093_s1 + $0x224] sm:$0xf]  ;;  %v1741_v27 = vor.u32 %v2027_v17, %v1740_v16  ;;  %v1900_v28 = vld [vmem:[%s3095_s3 + $0x258] sm:$0xf]  ;;  %v2067_v29 = vld [vmem:[%s3095_s3 + $0x268] sm:$0xf0]  ;;  %v1523_v33 = vor.u32 %v1970_v22, %v1520_v23 }
  0x3f   :  { %578 = vmatpush.bf16.msrb.mxu3 %v1451_v8  ;;  %v1584_v30 = vld [vmem:[%s3093_s1 + $0x228] sm:$0xf0]  ;;  %v1720_v31 = vld [vmem:[%s3095_s3 + $0xf0] sm:$0xf]  ;;  %v2022_v32 = vld [vmem:[%s3095_s3 + $0x100] sm:$0xf0]  ;;  %v1901_v25 = vor.u32 %v2067_v29, %v1900_v28 }
  0x40   :  { %588 = vmatpush.bf16.msra.mxu0 %v1539_v9  ;;  %v1968_v34 = vld [vmem:[%s3093_s1 + $0x194] sm:$0xf]  ;;  %v1512_v35 = vld [vmem:[%s3093_s1 + $0x198] sm:$0xf0]  ;;  %v1587_v36 = vor.u32 %v1986_v26, %v1584_v30  ;;  %v1721_v38 = vor.u32 %v2022_v32, %v1720_v31  ;;  %v1880_v39 = vld [vmem:[%s3095_s3 + $0x230] sm:$0xf] }
  0x41   :  { %553 = vmatpush.bf16.msrb.mxu1 %v1315_v18  ;;  %v1984_v37 = vld [vmem:[%s3093_s1 + $0x214] sm:$0xf]  ;;  %v2062_v40 = vld [vmem:[%s3095_s3 + $0x240] sm:$0xf0]  ;;  %v1576_v41 = vld [vmem:[%s3093_s1 + $0x218] sm:$0xf0]  ;;  %v1515_v44 = vor.u32 %v1968_v34, %v1512_v35 }
  0x42   :  { %566 = vmatpush.bf16.msrb.mxu2 %v1379_v19  ;;  %v1700_v42 = vld [vmem:[%s3095_s3 + $0xc8] sm:$0xf]  ;;  %v2017_v43 = vld [vmem:[%s3095_s3 + $0xd8] sm:$0xf0]  ;;  %v1966_v45 = vld [vmem:[%s3093_s1 + $0x184] sm:$0xf] }
  0x43   :  { %579 = vmatpush.bf16.msrb.mxu3 %v1443_v20  ;;  %v1504_v47 = vld [vmem:[%s3093_s1 + $0x188] sm:$0xf0]  ;;  %v1982_v48 = vld [vmem:[%s3093_s1 + $0x204] sm:$0xf]  ;;  %v1680_v50 = vld [vmem:[%s3095_s3 + $0xa0] sm:$0xf] }
  0x44   :  { %589 = vmatpush.bf16.msra.mxu0 %v1531_v21  ;;  %554 = vmatmul.bf16.vlgmr.msrb.gmra.mxu1 %v2362_v52  ;;  %v1881_v52 = vor.u32 %v2062_v40, %v1880_v39  ;;  %v1568_v49 = vld [vmem:[%s3093_s1 + $0x208] sm:$0xf0]  ;;  %v2012_v51 = vld [vmem:[%s3095_s3 + $0xb0] sm:$0xf0]  ;;  %v2025_v53 = vld [vmem:[%s3095_s3 + $0x11c] sm:$0xf]  ;;  %v1507_v55 = vor.u32 %v1966_v45, %v1504_v47 }
  0x45   :  { %602 = vmatpush.bf16.msra.mxu1 %v1595_v24  ;;  %567 = vmatmul.bf16.vlgmr.msrb.gmra.mxu2 %v2379_v58  ;;  %v1579_v58 = vor.u32 %v1984_v37, %v1576_v41  ;;  %v1742_v54 = vld [vmem:[%s3095_s3 + $0x12c] sm:$0xf0]  ;;  %v1571_v56 = vor.u32 %v1982_v48, %v1568_v49  ;;  %v1681_v57 = vor.u32 %v2012_v51, %v1680_v50  ;;  %v1660_v62 = vld [vmem:[%s3095_s3 + $0x78] sm:$0xf]  ;;  %v2007_v63 = vld [vmem:[%s3095_s3 + $0x88] sm:$0xf0] }
  0x46   :  { %1139 = vmatpush.bf16.msra.mxu2 %v1741_v27  ;;  %580 = vmatmul.bf16.vlgmr.msrb.gmra.mxu3 %v2381_v59  ;;  %v1701_v59 = vor.u32 %v2017_v43, %v1700_v42  ;;  %v1745_v60 = vor.u32 %v2025_v53, %v1742_v54  ;;  %v2020_v0 = vld [vmem:[%s3095_s3 + $0xf4] sm:$0xf]  ;;  %v1722_v1 = vld [vmem:[%s3095_s3 + $0x104] sm:$0xf0]  ;;  %v1661_v2 = vor.u32 %v2007_v63, %v1660_v62  ;;  %v1640_v4 = vld [vmem:[%s3095_s3 + $0x50] sm:$0xf] }
  0x47   :  { %1152 = vmatpush.bf16.msra.mxu3 %v1901_v25  ;;  %v1725_v3 = vor.u32 %v2020_v0, %v1722_v1  ;;  %v2002_v5 = vld [vmem:[%s3095_s3 + $0x60] sm:$0xf0]  ;;  %v2015_v6 = vld [vmem:[%s3095_s3 + $0xcc] sm:$0xf]  ;;  %v1702_v7 = vld [vmem:[%s3095_s3 + $0xdc] sm:$0xf0] }
  0x48   :  { %590 = vmatpush.bf16.msra.mxu0 %v1523_v33  ;;  %v1641_v8 = vor.u32 %v2002_v5, %v1640_v4  ;;  %v1705_v9 = vor.u32 %v2015_v6, %v1702_v7  ;;  %v1620_v10 = vld [vmem:[%s3095_s3 + $0x28] sm:$0xf]  ;;  %v2010_v11 = vld [vmem:[%s3095_s3 + $0xa4] sm:$0xf]  ;;  %v1682_v12 = vld [vmem:[%s3095_s3 + $0xb4] sm:$0xf0] }
  0x49   :  { %603 = vmatpush.bf16.msra.mxu1 %v1587_v36  ;;  %v1685_v13 = vor.u32 %v2010_v11, %v1682_v12  ;;  %v1600_v14 = vld [vmem:[%s3095_s3] sm:$0xf]  ;;  %v1992_v15 = vld [vmem:[%s3095_s3 + $0x10] sm:$0xf0]  ;;  %v2005_v16 = vld [vmem:[%s3095_s3 + $0x7c] sm:$0xf] }
  0x4a   :  { %1140 = vmatpush.bf16.msra.mxu2 %v1721_v38  ;;  %v1662_v17 = vld [vmem:[%s3095_s3 + $0x8c] sm:$0xf0]  ;;  %v1748_v18 = vld [vmem:[%s3095_s3 + $0x120] sm:$0xf]  ;;  %v2028_v19 = vld [vmem:[%s3095_s3 + $0x130] sm:$0xf0]  ;;  %v1601_v20 = vor.u32 %v1992_v15, %v1600_v14 }
  0x4b   :  { %1153 = vmatpush.bf16.msra.mxu3 %v1881_v52  ;;  %v1665_v21 = vor.u32 %v2005_v16, %v1662_v17  ;;  %v1749_v22 = vor.u32 %v2028_v19, %v1748_v18  ;;  %v2000_v23 = vld [vmem:[%s3095_s3 + $0x54] sm:$0xf]  ;;  %v1642_v24 = vld [vmem:[%s3095_s3 + $0x64] sm:$0xf0]  ;;  %v1728_v26 = vld [vmem:[%s3095_s3 + $0xf8] sm:$0xf] }
  0x4c   :  { %591 = vmatpush.bf16.msra.mxu0 %v1515_v44  ;;  %v2023_v27 = vld [vmem:[%s3095_s3 + $0x108] sm:$0xf0]  ;;  %v1645_v28 = vor.u32 %v2000_v23, %v1642_v24  ;;  %v1860_v30 = vld [vmem:[%s3095_s3 + $0x208] sm:$0xf]  ;;  %v2057_v31 = vld [vmem:[%s3095_s3 + $0x218] sm:$0xf0] }
  0x4d   :  { %604 = vmatpush.bf16.msra.mxu1 %v1579_v58  ;;  %v1729_v29 = vor.u32 %v2023_v27, %v1728_v26  ;;  %v1995_v32 = vld [vmem:[%s3095_s3 + $0x2c] sm:$0xf]  ;;  %v1861_v33 = vor.u32 %v2057_v31, %v1860_v30  ;;  %v1622_v34 = vld [vmem:[%s3095_s3 + $0x3c] sm:$0xf0]  ;;  %v1708_v35 = vld [vmem:[%s3095_s3 + $0xd0] sm:$0xf] }
  0x4e   :  { %1141 = vmatpush.bf16.msra.mxu2 %v1701_v59  ;;  %v2018_v25 = vld [vmem:[%s3095_s3 + $0xe0] sm:$0xf0]  ;;  %v1625_v36 = vor.u32 %v1995_v32, %v1622_v34  ;;  %v1840_v38 = vld [vmem:[%s3095_s3 + $0x1e0] sm:$0xf]  ;;  %v2052_v39 = vld [vmem:[%s3095_s3 + $0x1f0] sm:$0xf0] }
  0x4f   :  { %v1709_v37 = vor.u32 %v2018_v25, %v1708_v35  ;;  %v1990_v40 = vld [vmem:[%s3095_s3 + $0x4] sm:$0xf]  ;;  %1154 = vmatpush.bf16.msra.mxu3 %v1861_v33  ;;  %v1841_v41 = vor.u32 %v2052_v39, %v1840_v38  ;;  %v1602_v42 = vld [vmem:[%s3095_s3 + $0x14] sm:$0xf0]  ;;  %v1688_v43 = vld [vmem:[%s3095_s3 + $0xa8] sm:$0xf] }
  0x50   :  { %592 = vmatpush.bf16.msra.mxu0 %v1507_v55  ;;  %v2013_v44 = vld [vmem:[%s3095_s3 + $0xb8] sm:$0xf0]  ;;  %v1605_v52 = vor.u32 %v1990_v40, %v1602_v42  ;;  %v1902_v47 = vld [vmem:[%s3095_s3 + $0x26c] sm:$0xf0]  ;;  %v2026_v48 = vld [vmem:[%s3095_s3 + $0x124] sm:$0xf] }
  0x51   :  { %605 = vmatpush.bf16.msra.mxu1 %v1571_v56  ;;  %v1689_v58 = vor.u32 %v2013_v44, %v1688_v43  ;;  %v2065_v45 = vld [vmem:[%s3095_s3 + $0x25c] sm:$0xf]  ;;  %v1750_v49 = vld [vmem:[%s3095_s3 + $0x134] sm:$0xf0]  ;;  %v2047_v51 = vld [vmem:[%s3095_s3 + $0x1c8] sm:$0xf0] }
  0x52   :  { %1142 = vmatpush.bf16.msra.mxu2 %v1681_v57  ;;  %v1905_v59 = vor.u32 %v2065_v45, %v1902_v47  ;;  %v1820_v50 = vld [vmem:[%s3095_s3 + $0x1b8] sm:$0xf]  ;;  %v1753_v53 = vor.u32 %v2026_v48, %v1750_v49  ;;  %v1668_v55 = vld [vmem:[%s3095_s3 + $0x80] sm:$0xf]  ;;  %v2008_v56 = vld [vmem:[%s3095_s3 + $0x90] sm:$0xf0] }
  0x53   :  { %593 = vmatmul.bf16.vlgmr.msra.gmra.mxu0 %v2383_v61  ;;  %v1997_v61 = vld [vmem:[%s3095_s3 + $0x38] sm:$0xf0]  ;;  %1155 = vmatpush.bf16.msra.mxu3 %v1841_v41  ;;  %v1821_v54 = vor.u32 %v2047_v51, %v1820_v50  ;;  %v2060_v57 = vld [vmem:[%s3095_s3 + $0x234] sm:$0xf]  ;;  %v1882_v62 = vld [vmem:[%s3095_s3 + $0x244] sm:$0xf0] }
  0x54   :  { %1165 = vmatpush.bf16.msrb.mxu0 %v1745_v60  ;;  %1597 = vmatmul.msk.bf16.vlgmr.msra.gmra.mxu1 %vm477_vm0, %v2483_v46  ;;  %v1621_v46 = vor.u32 %v1997_v61, %v1620_v10  ;;  %v1669_v60 = vor.u32 %v2008_v56, %v1668_v55  ;;  %v2021_v63 = vld [vmem:[%s3095_s3 + $0xfc] sm:$0xf]  ;;  %v1730_v0 = vld [vmem:[%s3095_s3 + $0x10c] sm:$0xf0]  ;;  %v1885_v1 = vor.u32 %v2060_v57, %v1882_v62  ;;  %v2042_v4 = vld [vmem:[%s3095_s3 + $0x1a0] sm:$0xf0] }
  0x55   :  { %1178 = vmatpush.bf16.msrb.mxu1 %v1905_v59  ;;  %v1648_v5 = vld [vmem:[%s3095_s3 + $0x58] sm:$0xf]  ;;  %v2003_v7 = vld [vmem:[%s3095_s3 + $0x68] sm:$0xf0]  ;;  %v1862_v10 = vld [vmem:[%s3095_s3 + $0x21c] sm:$0xf0] }
  0x56   :  { %1143 = vmatpush.bf16.msra.mxu2 %v1661_v2  ;;  %v1733_v2 = vor.u32 %v2021_v63, %v1730_v0  ;;  %v2016_v61 = vld [vmem:[%s3095_s3 + $0xd4] sm:$0xf]  ;;  %v1710_v12 = vld [vmem:[%s3095_s3 + $0xe4] sm:$0xf0]  ;;  %v2037_v14 = vld [vmem:[%s3095_s3 + $0x178] sm:$0xf0] }
  0x57   :  { %1156 = vmatpush.bf16.msra.mxu3 %v1821_v54  ;;  %v1628_v15 = vld [vmem:[%s3095_s3 + $0x30] sm:$0xf]  ;;  %v1998_v17 = vld [vmem:[%s3095_s3 + $0x40] sm:$0xf0]  ;;  %v1842_v19 = vld [vmem:[%s3095_s3 + $0x1f4] sm:$0xf0] }
  0x58   :  { %1166 = vmatpush.bf16.msrb.mxu0 %v1725_v3  ;;  %v1800_v3 = vld [vmem:[%s3095_s3 + $0x190] sm:$0xf]  ;;  %v2050_v18 = vld [vmem:[%s3095_s3 + $0x1e4] sm:$0xf]  ;;  %v1690_v23 = vld [vmem:[%s3095_s3 + $0xbc] sm:$0xf0] }
  0x59   :  { %v1801_v6 = vor.u32 %v2042_v4, %v1800_v3  ;;  %1179 = vmatpush.bf16.msrb.mxu1 %v1885_v1  ;;  %v1760_v26 = vld [vmem:[%s3095_s3 + $0x140] sm:$0xf]  ;;  %v2032_v27 = vld [vmem:[%s3095_s3 + $0x150] sm:$0xf0]  ;;  %v1993_v30 = vld [vmem:[%s3095_s3 + $0x18] sm:$0xf0] }
  0x5a   :  { %1144 = vmatpush.bf16.msra.mxu2 %v1641_v8  ;;  %v1649_v8 = vor.u32 %v2003_v7, %v1648_v5  ;;  %v2045_v31 = vld [vmem:[%s3095_s3 + $0x1bc] sm:$0xf]  ;;  %v1822_v32 = vld [vmem:[%s3095_s3 + $0x1cc] sm:$0xf0]  ;;  %v1908_v35 = vld [vmem:[%s3095_s3 + $0x260] sm:$0xf] }
  0x5b   :  { %1157 = vmatpush.bf16.msra.mxu3 %v1801_v6  ;;  %v1825_v34 = vor.u32 %v2045_v31, %v1822_v32  ;;  %v2068_v25 = vld [vmem:[%s3095_s3 + $0x270] sm:$0xf0]  ;;  %v1670_v39 = vld [vmem:[%s3095_s3 + $0x94] sm:$0xf0]  ;;  %v1802_v42 = vld [vmem:[%s3095_s3 + $0x1a4] sm:$0xf0] }
  0x5c   :  { %1167 = vmatpush.bf16.msrb.mxu0 %v1705_v9  ;;  %v2055_v9 = vld [vmem:[%s3095_s3 + $0x20c] sm:$0xf]  ;;  %v1909_v38 = vor.u32 %v2068_v25, %v1908_v35  ;;  %v2040_v41 = vld [vmem:[%s3095_s3 + $0x194] sm:$0xf]  ;;  %v1888_v43 = vld [vmem:[%s3095_s3 + $0x238] sm:$0xf] }
  0x5d   :  { %v1865_v11 = vor.u32 %v2055_v9, %v1862_v10  ;;  %v1805_v44 = vor.u32 %v2040_v41, %v1802_v42  ;;  %v1650_v45 = vld [vmem:[%s3095_s3 + $0x6c] sm:$0xf0]  ;;  %v2035_v49 = vld [vmem:[%s3095_s3 + $0x16c] sm:$0xf]  ;;  %v1782_v50 = vld [vmem:[%s3095_s3 + $0x17c] sm:$0xf0] }
  0x5e   :  { %1145 = vmatpush.bf16.msra.mxu2 %v1621_v46  ;;  %v1713_v46 = vor.u32 %v2016_v61, %v1710_v12  ;;  %v1868_v51 = vld [vmem:[%s3095_s3 + $0x210] sm:$0xf]  ;;  %v1785_v54 = vor.u32 %v2035_v49, %v1782_v50  ;;  %v2058_v55 = vld [vmem:[%s3095_s3 + $0x220] sm:$0xf0]  ;;  %v1996_v56 = vld [vmem:[%s3095_s3 + $0x34] sm:$0xf] }
  0x5f   :  { %1180 = vmatpush.bf16.msrb.mxu1 %v1865_v11  ;;  %v1630_v57 = vld [vmem:[%s3095_s3 + $0x44] sm:$0xf0]  ;;  %v1869_v62 = vor.u32 %v2058_v55, %v1868_v51  ;;  %v2030_v1 = vld [vmem:[%s3095_s3 + $0x144] sm:$0xf]  ;;  %v2053_v5 = vld [vmem:[%s3095_s3 + $0x1f8] sm:$0xf0] }
  0x60   :  { %1168 = vmatpush.bf16.msrb.mxu0 %v1685_v13  ;;  %v1780_v13 = vld [vmem:[%s3095_s3 + $0x168] sm:$0xf]  ;;  %v1633_v63 = vor.u32 %v1996_v56, %v1630_v57  ;;  %v1991_v6 = vld [vmem:[%s3095_s3 + $0xc] sm:$0xf]  ;;  %v1610_v7 = vld [vmem:[%s3095_s3 + $0x1c] sm:$0xf0] }
  0x61   :  { %v1781_v16 = vor.u32 %v2037_v14, %v1780_v13  ;;  %v1848_v3 = vld [vmem:[%s3095_s3 + $0x1e8] sm:$0xf]  ;;  %v1613_v9 = vor.u32 %v1991_v6, %v1610_v7  ;;  %v2066_v10 = vld [vmem:[%s3095_s3 + $0x264] sm:$0xf]  ;;  %v1910_v11 = vld [vmem:[%s3095_s3 + $0x274] sm:$0xf0] }
  0x62   :  { %1146 = vmatpush.bf16.msra.mxu2 %v1601_v20  ;;  %v1629_v20 = vor.u32 %v1998_v17, %v1628_v15  ;;  %v1828_v13 = vld [vmem:[%s3095_s3 + $0x1c0] sm:$0xf]  ;;  %v2048_v14 = vld [vmem:[%s3095_s3 + $0x1d0] sm:$0xf0]  ;;  %v1788_v32 = vld [vmem:[%s3095_s3 + $0x170] sm:$0xf] }
  0x63   :  { %1158 = vmatpush.bf16.msra.mxu3 %v1781_v16  ;;  %v1829_v17 = vor.u32 %v2048_v14, %v1828_v13  ;;  %v2051_v25 = vld [vmem:[%s3095_s3 + $0x1ec] sm:$0xf]  ;;  %v1756_v41 = vld [vmem:[%s3095_s3 + $0x128] sm:$0xf]  ;;  %v2029_v42 = vld [vmem:[%s3095_s3 + $0x138] sm:$0xf0] }
  0x64   :  { %1169 = vmatpush.bf16.msrb.mxu0 %v1665_v21  ;;  %v1845_v21 = vor.u32 %v2050_v18, %v1842_v19  ;;  %v2061_v18 = vld [vmem:[%s3095_s3 + $0x23c] sm:$0xf]  ;;  %v1890_v19 = vld [vmem:[%s3095_s3 + $0x24c] sm:$0xf0]  ;;  %v1736_v49 = vld [vmem:[%s3095_s3 + $0x100] sm:$0xf] }
  0x65   :  { %v2024_v50 = vld [vmem:[%s3095_s3 + $0x110] sm:$0xf0]  ;;  %v1716_v57 = vld [vmem:[%s3095_s3 + $0xd8] sm:$0xf]  ;;  %v2031_v6 = vld [vmem:[%s3095_s3 + $0x14c] sm:$0xf] }
  0x66   :  { %1191 = vmatpush.bf16.msrb.mxu2 %v1749_v22  ;;  %v2011_v22 = vld [vmem:[%s3095_s3 + $0xac] sm:$0xf]  ;;  %1181 = vmatpush.bf16.msrb.mxu1 %v1845_v21  ;;  %v1893_v21 = vor.u32 %v2061_v18, %v1890_v19  ;;  %v1737_v56 = vor.u32 %v2024_v50, %v1736_v49  ;;  %v1770_v7 = vld [vmem:[%s3095_s3 + $0x15c] sm:$0xf0]  ;;  %vm1278_vm1 = vcmask 1040384   ;;  %vm1280_vm2 = vcmask 1041408  }
  0x67   :  { %v1693_v24 = vor.u32 %v2011_v22, %v1690_v23  ;;  %v1808_v23 = vld [vmem:[%s3095_s3 + $0x198] sm:$0xf]  ;;  %v1816_v50 = vld [vmem:[%s3095_s3 + $0x1a0] sm:$0xf]  ;;  %vm1282_vm3 = vcmask 1043459   ;;  %s1299_s24 = sshll.u32 %s3097_s5, 4  ;;  %s1300_s24 = int_to_ptr.hbm [resolvable:$true] %s1299_s24 }
  0x68   :  { %1170 = vmatpush.bf16.msrb.mxu0 %v1645_v28  ;;  %v1608_v28 = vld [vmem:[%s3095_s3 + $0x8] sm:$0xf]  ;;  %vm1284_vm4 = vcmask 1042432  }
  0x69   :  { %v1609_v33 = vor.u32 %v1993_v30, %v1608_v28  ;;  %v1870_v28 = vld [vmem:[%s3095_s3 + $0x224] sm:$0xf0] }
  0x6a   :  { %1192 = vmatpush.bf16.msrb.mxu2 %v1729_v29  ;;  %v1761_v29 = vor.u32 %v2032_v27, %v1760_v26  ;;  %1182 = vmatpush.bf16.msrb.mxu1 %v1825_v34  ;;  %v2056_v27 = vld [vmem:[%s3095_s3 + $0x214] sm:$0xf] }
  0x6c   :  { %1171 = vmatpush.bf16.msrb.mxu0 %v1625_v36  ;;  %v2006_v36 = vld [vmem:[%s3095_s3 + $0x84] sm:$0xf]  ;;  %1159 = vmatpush.bf16.msra.mxu3 %v1761_v29  ;;  %v1873_v29 = vor.u32 %v2056_v27, %v1870_v28 }
  0x6d   :  { %v1673_v40 = vor.u32 %v2006_v36, %v1670_v39  ;;  %v1850_v36 = vld [vmem:[%s3095_s3 + $0x1fc] sm:$0xf0] }
  0x6e   :  { %1193 = vmatpush.bf16.msrb.mxu2 %v1709_v37  ;;  %v2850_v37 = vld [vmem:[%s3094_s2] sm:$0x3]  ;;  %1183 = vmatpush.bf16.msrb.mxu1 %v1805_v44  ;;  %v1853_v39 = vor.u32 %v2051_v25, %v1850_v36  ;;  %v2033_v44 = vld [vmem:[%s3095_s3 + $0x158] sm:$0xf0] }
  0x6f   :  { %v473_v59 = vperm.slane %v2850_v37, 0 }
  0x70   :  { %1172 = vmatpush.bf16.msrb.mxu0 %v1605_v52  ;;  %1204 = vmatpush.bf16.msrb.mxu3 %v1909_v38  ;;  %v2063_v52 = vld [vmem:[%s3095_s3 + $0x248] sm:$0xf0] }
  0x71   :  { %v1889_v47 = vor.u32 %v2063_v52, %v1888_v43  ;;  %v1768_v43 = vld [vmem:[%s3095_s3 + $0x148] sm:$0xf] }
  0x72   :  { %1194 = vmatpush.bf16.msrb.mxu2 %v1689_v58  ;;  %v2001_v58 = vld [vmem:[%s3095_s3 + $0x5c] sm:$0xf]  ;;  %1184 = vmatpush.bf16.msrb.mxu1 %v1785_v54  ;;  %v1810_v54 = vld [vmem:[%s3095_s3 + $0x1ac] sm:$0xf0] }
  0x73   :  { %v1653_v48 = vor.u32 %v2001_v58, %v1650_v45  ;;  %v1769_v58 = vor.u32 %v2033_v44, %v1768_v43  ;;  %v2046_v45 = vld [vmem:[%s3095_s3 + $0x1c4] sm:$0xf]  ;;  %v1876_v43 = vld [vmem:[%s3095_s3 + $0x218] sm:$0xf]  ;;  %v2059_v44 = vld [vmem:[%s3095_s3 + $0x228] sm:$0xf0] }
  0x74   :  { %1217 = vmatpush.bf16.msra.mxu0 %v1753_v53  ;;  %1205 = vmatpush.bf16.msrb.mxu3 %v1889_v47  ;;  %v1757_v47 = vor.u32 %v2029_v42, %v1756_v41 }
  0x76   :  { %1195 = vmatpush.bf16.msrb.mxu2 %v1669_v60 }
  0x78   :  { %1218 = vmatpush.bf16.msra.mxu0 %v1733_v2  ;;  %1206 = vmatpush.bf16.msrb.mxu3 %v1869_v62  ;;  %v1762_v2 = vld [vmem:[%s3095_s3 + $0x154] sm:$0xf0]  ;;  %v2019_v62 = vld [vmem:[%s3095_s3 + $0xe8] sm:$0xf0] }
  0x79   :  { %v1765_v4 = vor.u32 %v2030_v1, %v1762_v2  ;;  %v1717_v1 = vor.u32 %v2019_v62, %v1716_v57  ;;  %v1696_v2 = vld [vmem:[%s3095_s3 + $0xb0] sm:$0xf] }
  0x7a   :  { %1196 = vmatpush.bf16.msrb.mxu2 %v1649_v8  ;;  %v1849_v8 = vor.u32 %v2053_v5, %v1848_v3  ;;  %v2014_v5 = vld [vmem:[%s3095_s3 + $0xc0] sm:$0xf0]  ;;  %v1776_v57 = vld [vmem:[%s3095_s3 + $0x150] sm:$0xf] }
  0x7b   :  { %1185 = vmatpush.bf16.msrb.mxu1 %v1765_v4 }
  0x7c   :  { %1219 = vmatpush.bf16.msra.mxu0 %v1713_v46  ;;  %1207 = vmatpush.bf16.msrb.mxu3 %v1849_v8  ;;  %v1913_v46 = vor.u32 %v2066_v10, %v1910_v11  ;;  %v474_v8 = vperm.slane %v2850_v37, 1  ;;  %v1773_v10 = vor.u32 %v2031_v6, %v1770_v7  ;;  %v2009_v11 = vld [vmem:[%s3095_s3 + $0x98] sm:$0xf0] }
  0x7e   :  { %1197 = vmatpush.bf16.msrb.mxu2 %v1629_v20 }
  0x7f   :  { %1230 = vmatpush.bf16.msra.mxu1 %v1913_v46 }
  0x80   :  { %1220 = vmatpush.bf16.msra.mxu0 %v1693_v24  ;;  %1208 = vmatpush.bf16.msrb.mxu3 %v1829_v17  ;;  %v2043_v24 = vld [vmem:[%s3095_s3 + $0x1a8] sm:$0xf0]  ;;  %v2004_v17 = vld [vmem:[%s3095_s3 + $0x70] sm:$0xf0] }
  0x81   :  { %v1809_v26 = vor.u32 %v2043_v24, %v1808_v23 }
  0x82   :  { %1198 = vmatpush.bf16.msrb.mxu2 %v1609_v33  ;;  %v2038_v33 = vld [vmem:[%s3095_s3 + $0x180] sm:$0xf0] }
  0x83   :  { %1231 = vmatpush.bf16.msra.mxu1 %v1893_v21  ;;  %v1789_v35 = vor.u32 %v2038_v33, %v1788_v32  ;;  %v1999_v21 = vld [vmem:[%s3095_s3 + $0x48] sm:$0xf0]  ;;  %v1916_v32 = vld [vmem:[%s3095_s3 + $0x268] sm:$0xf]  ;;  %v2069_v33 = vld [vmem:[%s3095_s3 + $0x278] sm:$0xf0] }
  0x84   :  { %1221 = vmatpush.bf16.msra.mxu0 %v1673_v40  ;;  %1209 = vmatpush.bf16.msrb.mxu3 %v1809_v26  ;;  %v1917_v25 = vor.u32 %v2069_v33, %v1916_v32 }
  0x87   :  { %1232 = vmatpush.bf16.msra.mxu1 %v1873_v29  ;;  %v1616_v29 = vld [vmem:[%s3095_s3 + $0x10] sm:$0xf] }
  0x88   :  { %1222 = vmatpush.bf16.msra.mxu0 %v1653_v48  ;;  %1210 = vmatpush.bf16.msrb.mxu3 %v1789_v35  ;;  %v1830_v48 = vld [vmem:[%s3095_s3 + $0x1d4] sm:$0xf0] }
  0x89   :  { %v1833_v51 = vor.u32 %v2046_v45, %v1830_v48  ;;  %v2054_v45 = vld [vmem:[%s3095_s3 + $0x200] sm:$0xf0]  ;;  %v1836_v48 = vld [vmem:[%s3095_s3 + $0x1c8] sm:$0xf] }
  0x8b   :  { %1233 = vmatpush.bf16.msra.mxu1 %v1853_v39  ;;  %v1896_v39 = vld [vmem:[%s3095_s3 + $0x240] sm:$0xf] }
  0x8c   :  { %1223 = vmatpush.bf16.msra.mxu0 %v1633_v63  ;;  %1211 = vmatpush.bf16.msrb.mxu3 %v1769_v58  ;;  %v2036_v63 = vld [vmem:[%s3095_s3 + $0x174] sm:$0xf]  ;;  %v1856_v58 = vld [vmem:[%s3095_s3 + $0x1f0] sm:$0xf] }
  0x8f   :  { %1234 = vmatpush.bf16.msra.mxu1 %v1833_v51  ;;  %v2044_v51 = vld [vmem:[%s3095_s3 + $0x1b0] sm:$0xf0] }
  0x90   :  { %1224 = vmatpush.bf16.msra.mxu0 %v1613_v9  ;;  %v1697_v9 = vor.u32 %v2014_v5, %v1696_v2 }
  0xa0   :  { %v490_v53 = vpop.f32.mrf.mxu0 }
  0xa1   :  { %v503_v60 = vpop.f32.mrf.mxu1  ;;  %v491_v0 = vadd.f32 %v490_v53, %v473_v59  ;;  %v2041_v53 = vld [vmem:[%s3095_s3 + $0x19c] sm:$0xf] }
  0xa3   :  { %v504_v61 = vadd.f32 %v503_v60, %v491_v0  ;;  %v1813_v60 = vor.u32 %v2041_v53, %v1810_v54  ;;  %v1790_v0 = vld [vmem:[%s3095_s3 + $0x184] sm:$0xf0]  ;;  %v1817_v53 = vor.u32 %v2044_v51, %v1816_v50  ;;  %v1796_v54 = vld [vmem:[%s3095_s3 + $0x178] sm:$0xf] }
  0xa4   :  { %v1793_v3 = vor.u32 %v2036_v63, %v1790_v0 }
  0xa5   :  { %1235 = vmatpush.bf16.msra.mxu1 %v1813_v60  ;;  %v2034_v60 = vld [vmem:[%s3095_s3 + $0x160] sm:$0xf0] }
  0xa6   :  { %v1777_v62 = vor.u32 %v2034_v60, %v1776_v57 }
  0xa8   :  { %v516_v12 = vpop.f32.mrf.mxu2  ;;  %v492_v15 = vpop.f32.mrf.mxu0 }
  0xa9   :  { %v529_v16 = vpop.f32.mrf.mxu3  ;;  %v505_v20 = vpop.f32.mrf.mxu1  ;;  %v517_v22 = vadd.f32 %v516_v12, %v504_v61  ;;  %1236 = vmatpush.bf16.msra.mxu1 %v1793_v3  ;;  %v1676_v61 = vld [vmem:[%s3095_s3 + $0x88] sm:$0xf] }
  0xaa   :  { %v1677_v14 = vor.u32 %v2009_v11, %v1676_v61  ;;  %v1636_v20 = vld [vmem:[%s3095_s3 + $0x38] sm:$0xf] }
  0xab   :  { %v530_v30 = vadd.f32 %v529_v16, %v517_v22  ;;  %v1656_v16 = vld [vmem:[%s3095_s3 + $0x60] sm:$0xf]  ;;  %v1637_v27 = vor.u32 %v1999_v21, %v1636_v20 }
  0xac   :  { %v1657_v18 = vor.u32 %v2004_v17, %v1656_v16 }
  0xad   :  { %1237 = vmatpush.bf16.msra.mxu1 %v1773_v10 }
  0xb0   :  { %v518_v31 = vpop.f32.mrf.mxu2  ;;  %v542_v38 = vpop.f32.mrf.mxu0 }
  0xb1   :  { %v531_v34 = vpop.f32.mrf.mxu3  ;;  %v543_v40 = vadd.f32 %v542_v38, %v530_v30  ;;  %v1994_v31 = vld [vmem:[%s3095_s3 + $0x20] sm:$0xf0] }
  0xb2   :  { %v1617_v35 = vor.u32 %v1994_v31, %v1616_v29  ;;  %v1287_v31 = vlaneseq }
  0xb3   :  { %v611_v52 = vmax.f32 %v543_v40, 0.0  ;;  %v2064_v40 = vld [vmem:[%s3095_s3 + $0x250] sm:$0xf0] }
  0xb4   :  { %v1897_v42 = vor.u32 %v2064_v40, %v1896_v39  ;;  %vm1289_vm5 = vcmp.lt.s32.totalorder %v1287_v31, 576 }
  0xb5   :  { %v2970_v59 = vpack.c.bf16 %v611_v52, %v611_v52  ;;  %v1877_v52 = vor.u32 %v2059_v44, %v1876_v43 }
  0xb7   :  { %1147 = vmatmul.bf16.vlgmr.msra.gmra.mxu2 %v2970_v59  ;;  %1173 = vmatmul.bf16.vlgmr.msrb.gmra.mxu0 %v2970_v59 }
  0xb8   :  { %1243 = vmatpush.bf16.msra.mxu2 %v1757_v47  ;;  %v544_v55 = vpop.f32.mrf.mxu0  ;;  %v1857_v47 = vor.u32 %v2054_v45, %v1856_v58 }
  0xb9   :  { %v2039_v55 = vld [vmem:[%s3095_s3 + $0x188] sm:$0xf0] }
  0xbc   :  { %1244 = vmatpush.bf16.msra.mxu2 %v1737_v56  ;;  %v1797_v56 = vor.u32 %v2039_v55, %v1796_v54 }
  0xc0   :  { %1245 = vmatpush.bf16.msra.mxu2 %v1717_v1 }
  0xc1   :  { %v555_v4 = vpop.f32.mrf.mxu1 }
  0xc2   :  { %v556_v12 = vadd.f32 %v555_v4, %v474_v8 }
  0xc4   :  { %1246 = vmatpush.bf16.msra.mxu2 %v1697_v9 }
  0xc7   :  { %1199 = vmatmul.bf16.vlgmr.msrb.gmra.mxu2 %v2970_v59  ;;  %1225 = vmatmul.bf16.vlgmr.msra.gmra.mxu0 %v2970_v59 }
  0xc8   :  { %v568_v46 = vpop.f32.mrf.mxu2  ;;  %1247 = vmatpush.bf16.msra.mxu2 %v1677_v14  ;;  %v711_v14 = vld [vmem:[%s3096_s4] sm:$0x1f]  ;;  %s2097_s4 = smov [#allocation2]  }
  0xc9   :  { %v581_v13 = vpop.f32.mrf.mxu3  ;;  %v569_v15 = vadd.f32 %v568_v46, %v556_v12  ;;  %v557_v37 = vpop.f32.mrf.mxu1  ;;  %v1132_v17 = vperm.slane %v711_v14, 3  ;;  %v1133_v20 = vperm.slane %v711_v14, 4  ;;  %s1297_s21 = sshll.u32 %s2097_s4, 4  ;;  %s1298_s21 = int_to_ptr.vmem [resolvable:$true] %s1297_s21 }
  0xca   :  { %v1130_v37 = vperm.slane %v711_v14, 1 }
  0xcb   :  { %v582_v19 = vadd.f32 %v581_v13, %v569_v15  ;;  %v1131_v15 = vperm.slane %v711_v14, 2 }
  0xcc   :  { %1248 = vmatpush.bf16.msra.mxu2 %v1657_v18  ;;  %v1129_v18 = vperm.slane %v711_v14, 0 }
  0xd0   :  { %v594_v22 = vpop.f32.mrf.mxu0  ;;  %v570_v24 = vpop.f32.mrf.mxu2  ;;  %1249 = vmatpush.bf16.msra.mxu2 %v1637_v27 }
  0xd1   :  { %v595_v23 = vadd.f32 %v594_v22, %v582_v19  ;;  %v583_v26 = vpop.f32.mrf.mxu3  ;;  %v607_v28 = vpop.f32.mrf.mxu1 }
  0xd3   :  { %v608_v30 = vadd.f32 %v607_v28, %v595_v23 }
  0xd4   :  { %1250 = vmatpush.bf16.msra.mxu2 %v1617_v35 }
  0xd5   :  { %v612_v34 = vmax.f32 %v608_v30, 0.0 }
  0xd7   :  { %v614_v36 = vpack.c.bf16 %v612_v34, %v612_v34  ;;  %1251 = vmatmul.bf16.vlgmr.msra.gmra.mxu2 %v2970_v59  ;;  %v2049_v59 = vld [vmem:[%s3095_s3 + $0x1d8] sm:$0xf0] }
  0xd8   :  { %v596_v38 = vpop.f32.mrf.mxu0  ;;  %v1837_v49 = vor.u32 %v2049_v59, %v1836_v48 }
  0xd9   :  { %1160 = vmatmul.bf16.vlgmr.msra.gmra.mxu3 %v614_v36  ;;  %1186 = vmatmul.bf16.vlgmr.msrb.gmra.mxu1 %v614_v36  ;;  %v609_v41 = vpop.f32.mrf.mxu1 }
  0xda   :  { %1256 = vmatpush.bf16.msra.mxu3 %v1917_v25 }
  0xde   :  { %1257 = vmatpush.bf16.msra.mxu3 %v1897_v42 }
  0xe2   :  { %1258 = vmatpush.bf16.msra.mxu3 %v1877_v52 }
  0xe6   :  { %1259 = vmatpush.bf16.msra.mxu3 %v1857_v47 }
  0xe9   :  { %1212 = vmatmul.bf16.vlgmr.msrb.gmra.mxu3 %v614_v36  ;;  %1238 = vmatmul.bf16.vlgmr.msra.gmra.mxu1 %v614_v36 }
  0xea   :  { %1260 = vmatpush.bf16.msra.mxu3 %v1837_v49 }
  0xee   :  { %1261 = vmatpush.bf16.msra.mxu3 %v1817_v53 }
  0xf2   :  { %1262 = vmatpush.bf16.msra.mxu3 %v1797_v56 }
  0xf6   :  { %1263 = vmatpush.bf16.msra.mxu3 %v1777_v62 }
  0xf9   :  { %1264 = vmatmul.bf16.vlgmr.msra.gmra.mxu3 %v614_v36 }
 0x134   :  { %v1174_v63 = vpop.f32.mrf.mxu0 }
 0x135   :  { %v1175_v21 = vadd.f32 %v1174_v63, %v1130_v37 }
 0x13a   :  { %v1148_v0 = vpop.f32.mrf.mxu2 }
 0x13b   :  { %v1149_v24 = vadd.f32 %v1148_v0, %v1129_v18 }
 0x13c   :  { %v1176_v1 = vpop.f32.mrf.mxu0 }
 0x142   :  { %v1150_v2 = vpop.f32.mrf.mxu2 }
 0x144   :  { %v1226_v3 = vpop.f32.mrf.mxu0 }
 0x145   :  { %v1227_v22 = vadd.f32 %v1226_v3, %v1132_v17 }
 0x14a   :  { %v1200_v4 = vpop.f32.mrf.mxu2 }
 0x14b   :  { %v1201_v19 = vadd.f32 %v1200_v4, %v1131_v15 }
 0x14c   :  { %v1228_v5 = vpop.f32.mrf.mxu0 }
 0x152   :  { %v1202_v7 = vpop.f32.mrf.mxu2 }
 0x156   :  { %v1187_v6 = vpop.f32.mrf.mxu1 }
 0x157   :  { %v1188_v26 = vadd.f32 %v1187_v6, %v1175_v21 }
 0x159   :  { %v1274_v34 = vrot.slane %v1188_v26, 7 }
 0x15a   :  { %v1252_v10 = vpop.f32.mrf.mxu2 }
 0x15b   :  { %v1253_v27 = vadd.f32 %v1252_v10, %v1133_v20 }
 0x15c   :  { %v1161_v8 = vpop.f32.mrf.mxu3 }
 0x15d   :  { %v1162_v29 = vadd.f32 %v1161_v8, %v1149_v24 }
 0x15e   :  { %v1189_v9 = vpop.f32.mrf.mxu1 }
 0x15f   :  { %v1279_v36 = vsel %vm1278_vm1, %v1162_v29, %v1274_v34 }
 0x162   :  { %v1254_v12 = vpop.f32.mrf.mxu2 }
 0x164   :  { %v1163_v61 = vpop.f32.mrf.mxu3 }
 0x166   :  { %v1239_v11 = vpop.f32.mrf.mxu1 }
 0x167   :  { %v1240_v28 = vadd.f32 %v1239_v11, %v1227_v22 }
 0x169   :  { %v1276_v35 = vrot.slane %v1240_v28, 5 }
 0x16c   :  { %v1213_v46 = vpop.f32.mrf.mxu3 }
 0x16d   :  { %v1214_v23 = vadd.f32 %v1213_v46, %v1201_v19 }
 0x16e   :  { %v1241_v13 = vpop.f32.mrf.mxu1 }
 0x16f   :  { %v1275_v32 = vrot.slane %v1214_v23, 6 }
 0x171   :  { %v1281_v38 = vsel %vm1280_vm2, %v1279_v36, %v1275_v32 }
 0x174   :  { %v1215_v16 = vpop.f32.mrf.mxu3 }
 0x17c   :  { %v1265_v30 = vpop.f32.mrf.mxu3 }
 0x17d   :  { %v1266_v33 = vadd.f32 %v1265_v30, %v1253_v27 }
 0x17f   :  { %v1277_v25 = vrot.slane %v1266_v33, 4 }
 0x181   :  { %v1283_v39 = vsel %vm1282_vm3, %v1276_v35, %v1277_v25 }
 0x182   :  { %v1285_v40 = vsel %vm1284_vm4, %v1281_v38, %v1283_v39 }
 0x183   :  { %1291 = vst.msk [vmem:[#allocation2] sm:$0x1f] %vm1289_vm5, %v1285_v40 }
 0x184   :  { %v1267_v41 = vpop.f32.mrf.mxu3  ;;  %1302 = dma.vmem_to_hbm [thread:$0]  %s1298_s21, 80, %s1300_s24, [#allocation3]  }
 0x185   :  { %2095 = dma.done.wait [#allocation3], 80  }
 0x186   :  { %2096 = vsyncadd [#allocation3], 4294967216 }
 0x187   :  { %1307 = vsyncpa [#allocation3], 1 }

</bundles_post_ra>
